<compile_context>
chip_gen: v6e
topology: v6e:2x2x1
jax: 0.10.0
libtpu: 0.0.40
codegen_flags: <defaults>
</compile_context>

<pallas_src>
import functools

import jax
import jax.numpy as jnp
from jax.experimental import pallas as pl
from jax.experimental.pallas import tpu as pltpu


def _round_up(x, m):
    return (x + m - 1) // m * m


def _pick_tile(hw, c):
    """Lane-dense pixel tile: as large as sensible, capped by a VMEM budget."""
    max_tile = 2048
    # double-buffered logits block: 2 * C * TILE * 4B  <=  ~8 MiB (safe on v7x too)
    cap = (8 * 1024 * 1024) // (8 * max(c, 1))
    cap = max(128, (cap // 128) * 128)
    return max(128, min(max_tile, cap, _round_up(hw, 128)))


def _pixel_stats_kernel(logits_ref, tgt_ref, nll_ref, prob_ref,
                        ce_ref, val_ref, keep_ref, *,
                        ignore_label, thresh, hw, tile):
    """Per-pixel CE stats + lane-wide running partials (CE sum / counts)."""
    i = pl.program_id(1)

    @pl.when(i == 0)
    def _init():
        ce_ref[...] = jnp.zeros_like(ce_ref)
        val_ref[...] = jnp.zeros_like(val_ref)
        keep_ref[...] = jnp.zeros_like(keep_ref)

    x = logits_ref[...].astype(jnp.float32)                    # (C, TILE)
    t = tgt_ref[...]                                            # (1, TILE) int32

    # Mask for lanes that are real pixels (handles the ragged last HW tile
    # without padding the logits in HBM).
    lane = jax.lax.broadcasted_iota(jnp.int32, (1, tile), 1) + i * tile
    real = lane < hw                                            # (1, TILE) bool

    x = jnp.where(real, x, 0.0)
    t = jnp.where(real, t, ignore_label)
    valid = jnp.logical_and(real, t != ignore_label)
    t_c = jnp.where(t == ignore_label, 0, t)                    # clamp ignore -> class 0

    m = jnp.max(x, axis=0, keepdims=True)                       # (1, TILE)
    lse = m + jnp.log(jnp.sum(jnp.exp(x - m), axis=0, keepdims=True))
    cls = jax.lax.broadcasted_iota(jnp.int32, x.shape, 0)
    x_t = jnp.sum(jnp.where(cls == t_c, x, 0.0), axis=0, keepdims=True)

    nll = lse - x_t                                             # -log p[target]
    prob = jnp.exp(x_t - lse)                                   # softmax prob at target

    nll_ref[...] = nll
    # Invalid (ignored or padded) pixels get prob=2.0 so they can never be
    # selected by `prob < threshold` and sort past every valid probability.
    prob_ref[...] = jnp.where(valid, prob, 2.0)

    # Lane-wide VMEM accumulators (reduced to scalars in XLA afterwards).
    # TODO(synk): plain-CE term clamps ignore_label to class 0 and averages over
    # all pixels; matches torch's CrossEntropyLoss() only when no ignore pixels.
    ce_ref[...] += jnp.where(real, nll, 0.0)
    val_ref[...] += valid.astype(jnp.float32)
    keep_ref[...] += jnp.logical_and(valid, prob <= jnp.float32(thresh)).astype(jnp.float32)


def _lane_fold(v, tile):
    """(1, tile) -> (1, 128) by summing aligned 128-lane chunks (no relayout)."""
    acc = v[:, 0:128]
    for k in range(1, tile // 128):
        acc = acc + v[:, k * 128:(k + 1) * 128]
    return acc


def _ohem_reduce_kernel(thr_ref, nll_ref, prob_ref, sel_ref, cnt_ref, *, tile):
    """Per-tile partial sums of OHEM-selected loss and selected-pixel count."""
    thr = thr_ref[0]                                            # SMEM scalar threshold
    sel = (prob_ref[...] < thr).astype(jnp.float32)             # invalid pixels = 2.0 -> never selected
    sel_ref[...] = _lane_fold(nll_ref[...] * sel, tile)
    cnt_ref[...] = _lane_fold(sel, tile)


@functools.partial(jax.jit,
                   static_argnames=("ignore_label", "thresh", "min_kept",
                                    "loss_weight"))
def ohem_cross_entropy(score, target, *, ignore_label=255, thresh=0.7,
                       min_kept=100000, loss_weight=1.0):
    """Forward of OhemCrossEntropy: 0.5 * CE + 0.5 * loss_weight * mean(OHEM losses)."""
    N, C, H, W = score.shape
    HW = H * W
    P = N * HW
    min_kept = max(1, int(min_kept))

    TILE = _pick_tile(HW, C)
    n_hw_tiles = pl.cdiv(HW, TILE)
    HW_pad = n_hw_tiles * TILE

    logits = score.reshape(N, C, HW)                # free reshape, no transpose/pad
    tgt = target.reshape(N, 1, HW).astype(jnp.int32)

    pix_spec = pl.BlockSpec((None, 1, TILE), lambda n, i: (n, 0, i))
    acc_spec = pl.BlockSpec((None, 1, TILE), lambda n, i: (n, 0, 0))

    # --- Kernel 1: per-pixel CE stats + fused partial reductions -------------
    nll, prob, ce_p, val_p, keep_p = pl.pallas_call(
        functools.partial(_pixel_stats_kernel, ignore_label=ignore_label,
                          thresh=float(thresh), hw=HW, tile=TILE),
        out_shape=(
            jax.ShapeDtypeStruct((N, 1, HW_pad), jnp.float32),   # nll
            jax.ShapeDtypeStruct((N, 1, HW_pad), jnp.float32),   # prob (2.0 = invalid)
            jax.ShapeDtypeStruct((N, 1, TILE), jnp.float32),     # CE partial sums
            jax.ShapeDtypeStruct((N, 1, TILE), jnp.float32),     # valid count partials
            jax.ShapeDtypeStruct((N, 1, TILE), jnp.float32),     # prob<=thresh count partials
        ),
        grid=(N, n_hw_tiles),
        in_specs=[pl.BlockSpec((None, C, TILE), lambda n, i: (n, 0, i)),
                  pix_spec],
        out_specs=(pix_spec, pix_spec, acc_spec, acc_spec, acc_spec),
        compiler_params=pltpu.CompilerParams(
            dimension_semantics=("parallel", "arbitrary")),
    )(logits, tgt)

    ce_sum = jnp.sum(ce_p)
    n_valid = jnp.sum(val_p)
    n_keep_le = jnp.sum(keep_p)

    # --- Glue: threshold = max(k-th smallest valid prob, thresh) -------------
    n_valid_i = n_valid.astype(jnp.int32)
    k = jnp.minimum(jnp.int32(min_kept), n_valid_i - 1)
    # Fast path: if >= k+1 valid pixels already have prob <= thresh, the k-th
    # smallest is <= thresh and the threshold is simply `thresh` (no sort).
    need_sort = jnp.logical_and(n_valid_i > 0,
                                n_keep_le < (k + 1).astype(jnp.float32))
    prob_flat = prob.reshape(-1)

    # TODO(synk): the rare fallback still uses a full XLA sort; a 256-bin
    # histogram quantile would replace it with two streaming passes.
    def _kth_smallest(p):
        sp = jnp.sort(p)
        return sp[jnp.clip(k, 0, p.shape[0] - 1)]

    min_value = jax.lax.cond(need_sort, _kth_smallest,
                             lambda p: jnp.asarray(thresh, jnp.float32), prob_flat)
    threshold = jnp.maximum(min_value, jnp.float32(thresh))
    thr_arr = jnp.reshape(threshold, (1,)).astype(jnp.float32)

    # --- Kernel 2: OHEM-selected loss sum & count (parallel per-tile partials)
    P_pad = N * HW_pad
    n_tiles2 = P_pad // TILE
    nll2 = nll.reshape(1, P_pad)
    prob2 = prob.reshape(1, P_pad)

    part_spec = pl.BlockSpec((1, 128), lambda j: (0, j))
    sel_parts, cnt_parts = pl.pallas_call(
        functools.partial(_ohem_reduce_kernel, tile=TILE),
        out_shape=(jax.ShapeDtypeStruct((1, n_tiles2 * 128), jnp.float32),) * 2,
        grid=(n_tiles2,),
        in_specs=[pl.BlockSpec(memory_space=pltpu.MemorySpace.SMEM),
                  pl.BlockSpec((1, TILE), lambda j: (0, j)),
                  pl.BlockSpec((1, TILE), lambda j: (0, j))],
        out_specs=(part_spec, part_spec),
        compiler_params=pltpu.CompilerParams(dimension_semantics=("parallel",)),
    )(thr_arr, nll2, prob2)

    loss_ce = ce_sum / jnp.float32(P)
    ohem_mean = jnp.sum(sel_parts) / jnp.maximum(jnp.sum(cnt_parts), 1.0)
    result = 0.5 * loss_ce + 0.5 * jnp.float32(loss_weight) * ohem_mean
    return jnp.where(n_valid_i > 0, result, jnp.float32(0.0))


def ohem_reference(score, target, ignore_label=255, thresh=0.7,
                   min_kept=100000, loss_weight=1.0):
    """Pure-JAX reference mirroring the PyTorch forward (no ignore labels in CE)."""
    N, C, H, W = score.shape
    logits = jnp.transpose(score, (0, 2, 3, 1)).reshape(-1, C)
    tgt = target.reshape(-1)
    logZ = jax.scipy.special.logsumexp(logits, axis=1)
    t_c = jnp.where(tgt == ignore_label, 0, tgt)
    x_t = jnp.take_along_axis(logits, t_c[:, None], axis=1)[:, 0]
    nll = logZ - x_t
    prob = jnp.exp(x_t - logZ)
    valid = tgt != ignore_label
    loss_ce = jnp.mean(nll)
    n_valid = jnp.sum(valid)
    sorted_p = jnp.sort(jnp.where(valid, prob, 2.0))
    k = jnp.minimum(min_kept, n_valid - 1)
    threshold = jnp.maximum(sorted_p[k], thresh)
    sel = valid & (prob < threshold)
    ohem = jnp.sum(jnp.where(sel, nll, 0.0)) / jnp.maximum(jnp.sum(sel), 1)
    return 0.5 * loss_ce + 0.5 * loss_weight * ohem


if __name__ == "__main__":
    key = jax.random.PRNGKey(0)
    k1, k2 = jax.random.split(key)
    N, C, H, W = 2, 4, 16, 16
    score = jax.random.normal(k1, (N, C, H, W), dtype=jnp.float32)
    target = jax.random.randint(k2, (N, H, W), 0, C, dtype=jnp.int32)

    loss = ohem_cross_entropy(score, target)
    jax.block_until_ready(loss)

    ref = ohem_reference(score, target)
    assert jnp.allclose(loss, ref, atol=1e-5, rtol=1e-5), (loss, ref)
    print("KERNEL_OK")
</pallas_src>

<mosaic_0001>
module attributes {stable_mosaic.version = 11 : i64} {
  func.func @_pixel_stats_kernel(%arg0: i32, %arg1: i32, %arg2: memref<1x4x256xf32, #tpu.memory_space<vmem>>, %arg3: memref<1x1x256xi32, #tpu.memory_space<vmem>>, %arg4: memref<1x1x256xf32, #tpu.memory_space<vmem>>, %arg5: memref<1x1x256xf32, #tpu.memory_space<vmem>>, %arg6: memref<1x1x256xf32, #tpu.memory_space<vmem>>, %arg7: memref<1x1x256xf32, #tpu.memory_space<vmem>>, %arg8: memref<1x1x256xf32, #tpu.memory_space<vmem>>) attributes {dimension_semantics = [#tpu.dimension_semantics<parallel>, #tpu.dimension_semantics<arbitrary>], iteration_bounds = array<i64: 2, 1>, scalar_prefetch = 0 : i64, scratch_operands = 0 : i64, tpu.core_type = #tpu.core_type<tc>, window_params = [{transform_indices = @transform_0, window_bounds = array<i64: 1, 4, 256>}, {transform_indices = @transform_1, window_bounds = array<i64: 1, 1, 256>}, {transform_indices = @transform_2, window_bounds = array<i64: 1, 1, 256>}, {transform_indices = @transform_3, window_bounds = array<i64: 1, 1, 256>}, {transform_indices = @transform_4, window_bounds = array<i64: 1, 1, 256>}, {transform_indices = @transform_5, window_bounds = array<i64: 1, 1, 256>}, {transform_indices = @transform_6, window_bounds = array<i64: 1, 1, 256>}]} {
    %c0_i32 = arith.constant 0 : i32
    %0 = arith.cmpi eq, %arg1, %c0_i32 : i32
    %1 = arith.extui %0 : i1 to i32
    %c0_i32_0 = arith.constant 0 : i32
    %2 = arith.cmpi ne, %1, %c0_i32_0 : i32
    scf.if %2 {
      %cst_41 = arith.constant 0.000000e+00 : f32
      %80 = vector.broadcast %cst_41 : f32 to vector<1x256xf32>
      %c0_42 = arith.constant 0 : index
      %c0_43 = arith.constant 0 : index
      %c0_44 = arith.constant 0 : index
      %81 = vector.load %arg6[%c0_42, %c0_43, %c0_44] : memref<1x1x256xf32, #tpu.memory_space<vmem>>, vector<1x1x256xf32>
      %82 = vector.shape_cast %81 : vector<1x1x256xf32> to vector<1x256xf32>
      %83 = vector.shape_cast %80 : vector<1x256xf32> to vector<1x1x256xf32>
      tpu.vector_store %arg6[%c0_42, %c0_43, %c0_44], %83 {strides = array<i32>} : memref<1x1x256xf32, #tpu.memory_space<vmem>>, vector<1x1x256xf32>,
      %cst_45 = arith.constant 0.000000e+00 : f32
      %84 = vector.broadcast %cst_45 : f32 to vector<1x256xf32>
      %c0_46 = arith.constant 0 : index
      %c0_47 = arith.constant 0 : index
      %c0_48 = arith.constant 0 : index
      %85 = vector.load %arg7[%c0_46, %c0_47, %c0_48] : memref<1x1x256xf32, #tpu.memory_space<vmem>>, vector<1x1x256xf32>
      %86 = vector.shape_cast %85 : vector<1x1x256xf32> to vector<1x256xf32>
      %87 = vector.shape_cast %84 : vector<1x256xf32> to vector<1x1x256xf32>
      tpu.vector_store %arg7[%c0_46, %c0_47, %c0_48], %87 {strides = array<i32>} : memref<1x1x256xf32, #tpu.memory_space<vmem>>, vector<1x1x256xf32>,
      %cst_49 = arith.constant 0.000000e+00 : f32
      %88 = vector.broadcast %cst_49 : f32 to vector<1x256xf32>
      %c0_50 = arith.constant 0 : index
      %c0_51 = arith.constant 0 : index
      %c0_52 = arith.constant 0 : index
      %89 = vector.load %arg8[%c0_50, %c0_51, %c0_52] : memref<1x1x256xf32, #tpu.memory_space<vmem>>, vector<1x1x256xf32>
      %90 = vector.shape_cast %89 : vector<1x1x256xf32> to vector<1x256xf32>
      %91 = vector.shape_cast %88 : vector<1x256xf32> to vector<1x1x256xf32>
      tpu.vector_store %arg8[%c0_50, %c0_51, %c0_52], %91 {strides = array<i32>} : memref<1x1x256xf32, #tpu.memory_space<vmem>>, vector<1x1x256xf32>,
    } else {
    }
    %c0 = arith.constant 0 : index
    %c0_1 = arith.constant 0 : index
    %c0_2 = arith.constant 0 : index
    %3 = vector.load %arg2[%c0, %c0_1, %c0_2] : memref<1x4x256xf32, #tpu.memory_space<vmem>>, vector<1x4x256xf32>
    %4 = vector.shape_cast %3 : vector<1x4x256xf32> to vector<4x256xf32>
    %c0_3 = arith.constant 0 : index
    %c0_4 = arith.constant 0 : index
    %c0_5 = arith.constant 0 : index
    %5 = vector.load %arg3[%c0_3, %c0_4, %c0_5] : memref<1x1x256xi32, #tpu.memory_space<vmem>>, vector<1x1x256xi32>
    %6 = vector.shape_cast %5 : vector<1x1x256xi32> to vector<1x256xi32>
    %7 = tpu.iota {dimensions = array<i32: 1>} : vector<1x256xi32>
    %c256_i32 = arith.constant 256 : i32
    %8 = arith.muli %arg1, %c256_i32 : i32
    %9 = vector.broadcast %8 : i32 to vector<1x256xi32>
    %10 = arith.addi %7, %9 : vector<1x256xi32>
    %c256_i32_6 = arith.constant 256 : i32
    %11 = vector.broadcast %c256_i32_6 : i32 to vector<1x256xi32>
    %12 = arith.cmpi slt, %10, %11 : vector<1x256xi32>
    %cst = arith.constant 0.000000e+00 : f32
    %13 = vector.shape_cast %12 : vector<1x256xi1> to vector<1x256xi1>
    %14 = vector.broadcast %13 : vector<1x256xi1> to vector<4x256xi1>
    %15 = vector.broadcast %cst : f32 to vector<4x256xf32>
    %16 = arith.select %14, %4, %15 : vector<4x256xi1>, vector<4x256xf32>
    %c255_i32 = arith.constant 255 : i32
    %17 = vector.broadcast %c255_i32 : i32 to vector<1x256xi32>
    %18 = arith.select %12, %6, %17 : vector<1x256xi1>, vector<1x256xi32>
    %c255_i32_7 = arith.constant 255 : i32
    %19 = vector.broadcast %c255_i32_7 : i32 to vector<1x256xi32>
    %20 = arith.cmpi ne, %18, %19 : vector<1x256xi32>
    %21 = arith.andi %12, %20 : vector<1x256xi1>
    %c255_i32_8 = arith.constant 255 : i32
    %22 = vector.broadcast %c255_i32_8 : i32 to vector<1x256xi32>
    %23 = arith.cmpi eq, %18, %22 : vector<1x256xi32>
    %c0_i32_9 = arith.constant 0 : i32
    %24 = vector.broadcast %c0_i32_9 : i32 to vector<1x256xi32>
    %25 = arith.select %23, %24, %18 : vector<1x256xi1>, vector<1x256xi32>
    %cst_10 = arith.constant dense<0xFF800000> : vector<256xf32>
    %26 = vector.multi_reduction <maximumf>, %16, %cst_10 [0] : vector<4x256xf32> to vector<256xf32>
    %27 = vector.shape_cast %26 : vector<256xf32> to vector<1x256xf32>
    %28 = vector.broadcast %27 : vector<1x256xf32> to vector<4x256xf32>
    %29 = arith.subf %16, %28 : vector<4x256xf32>
    %30 = math.exp %29 : vector<4x256xf32>
    %cst_11 = arith.constant dense<0.000000e+00> : vector<256xf32>
    %31 = vector.multi_reduction <add>, %30, %cst_11 [0] : vector<4x256xf32> to vector<256xf32>
    %32 = vector.shape_cast %31 : vector<256xf32> to vector<1x256xf32>
    %33 = math.log %32 : vector<1x256xf32>
    %34 = arith.addf %27, %33 : vector<1x256xf32>
    %35 = tpu.iota {dimensions = array<i32: 0>} : vector<4x256xi32>
    %36 = vector.broadcast %25 : vector<1x256xi32> to vector<4x256xi32>
    %37 = arith.cmpi eq, %35, %36 : vector<4x256xi32>
    %cst_12 = arith.constant 0.000000e+00 : f32
    %38 = vector.broadcast %cst_12 : f32 to vector<4x256xf32>
    %39 = arith.select %37, %16, %38 : vector<4x256xi1>, vector<4x256xf32>
    %cst_13 = arith.constant dense<0.000000e+00> : vector<256xf32>
    %40 = vector.multi_reduction <add>, %39, %cst_13 [0] : vector<4x256xf32> to vector<256xf32>
    %41 = vector.shape_cast %40 : vector<256xf32> to vector<1x256xf32>
    %42 = arith.subf %34, %41 : vector<1x256xf32>
    %43 = arith.subf %41, %34 : vector<1x256xf32>
    %44 = math.exp %43 : vector<1x256xf32>
    %c0_14 = arith.constant 0 : index
    %c0_15 = arith.constant 0 : index
    %c0_16 = arith.constant 0 : index
    %45 = vector.load %arg4[%c0_14, %c0_15, %c0_16] : memref<1x1x256xf32, #tpu.memory_space<vmem>>, vector<1x1x256xf32>
    %46 = vector.shape_cast %45 : vector<1x1x256xf32> to vector<1x256xf32>
    %47 = vector.shape_cast %42 : vector<1x256xf32> to vector<1x1x256xf32>
    tpu.vector_store %arg4[%c0_14, %c0_15, %c0_16], %47 {strides = array<i32>} : memref<1x1x256xf32, #tpu.memory_space<vmem>>, vector<1x1x256xf32>,
    %cst_17 = arith.constant 2.000000e+00 : f32
    %48 = vector.broadcast %cst_17 : f32 to vector<1x256xf32>
    %49 = arith.select %21, %44, %48 : vector<1x256xi1>, vector<1x256xf32>
    %c0_18 = arith.constant 0 : index
    %c0_19 = arith.constant 0 : index
    %c0_20 = arith.constant 0 : index
    %50 = vector.load %arg5[%c0_18, %c0_19, %c0_20] : memref<1x1x256xf32, #tpu.memory_space<vmem>>, vector<1x1x256xf32>
    %51 = vector.shape_cast %50 : vector<1x1x256xf32> to vector<1x256xf32>
    %52 = vector.shape_cast %49 : vector<1x256xf32> to vector<1x1x256xf32>
    tpu.vector_store %arg5[%c0_18, %c0_19, %c0_20], %52 {strides = array<i32>} : memref<1x1x256xf32, #tpu.memory_space<vmem>>, vector<1x1x256xf32>,
    %c0_21 = arith.constant 0 : index
    %c0_22 = arith.constant 0 : index
    %c0_23 = arith.constant 0 : index
    %53 = vector.load %arg6[%c0_21, %c0_22, %c0_23] : memref<1x1x256xf32, #tpu.memory_space<vmem>>, vector<1x1x256xf32>
    %54 = vector.shape_cast %53 : vector<1x1x256xf32> to vector<1x256xf32>
    %cst_24 = arith.constant 0.000000e+00 : f32
    %55 = vector.broadcast %cst_24 : f32 to vector<1x256xf32>
    %56 = arith.select %12, %42, %55 : vector<1x256xi1>, vector<1x256xf32>
    %57 = arith.addf %54, %56 : vector<1x256xf32>
    %c0_25 = arith.constant 0 : index
    %c0_26 = arith.constant 0 : index
    %c0_27 = arith.constant 0 : index
    %58 = vector.load %arg6[%c0_25, %c0_26, %c0_27] : memref<1x1x256xf32, #tpu.memory_space<vmem>>, vector<1x1x256xf32>
    %59 = vector.shape_cast %58 : vector<1x1x256xf32> to vector<1x256xf32>
    %60 = vector.shape_cast %57 : vector<1x256xf32> to vector<1x1x256xf32>
    tpu.vector_store %arg6[%c0_25, %c0_26, %c0_27], %60 {strides = array<i32>} : memref<1x1x256xf32, #tpu.memory_space<vmem>>, vector<1x1x256xf32>,
    %c0_28 = arith.constant 0 : index
    %c0_29 = arith.constant 0 : index
    %c0_30 = arith.constant 0 : index
    %61 = vector.load %arg7[%c0_28, %c0_29, %c0_30] : memref<1x1x256xf32, #tpu.memory_space<vmem>>, vector<1x1x256xf32>
    %62 = vector.shape_cast %61 : vector<1x1x256xf32> to vector<1x256xf32>
    %63 = arith.extui %21 : vector<1x256xi1> to vector<1x256xi32>
    %64 = arith.sitofp %63 : vector<1x256xi32> to vector<1x256xf32>
    %65 = arith.addf %62, %64 : vector<1x256xf32>
    %c0_31 = arith.constant 0 : index
    %c0_32 = arith.constant 0 : index
    %c0_33 = arith.constant 0 : index
    %66 = vector.load %arg7[%c0_31, %c0_32, %c0_33] : memref<1x1x256xf32, #tpu.memory_space<vmem>>, vector<1x1x256xf32>
    %67 = vector.shape_cast %66 : vector<1x1x256xf32> to vector<1x256xf32>
    %68 = vector.shape_cast %65 : vector<1x256xf32> to vector<1x1x256xf32>
    tpu.vector_store %arg7[%c0_31, %c0_32, %c0_33], %68 {strides = array<i32>} : memref<1x1x256xf32, #tpu.memory_space<vmem>>, vector<1x1x256xf32>,
    %c0_34 = arith.constant 0 : index
    %c0_35 = arith.constant 0 : index
    %c0_36 = arith.constant 0 : index
    %69 = vector.load %arg8[%c0_34, %c0_35, %c0_36] : memref<1x1x256xf32, #tpu.memory_space<vmem>>, vector<1x1x256xf32>
    %70 = vector.shape_cast %69 : vector<1x1x256xf32> to vector<1x256xf32>
    %cst_37 = arith.constant 0.699999988 : f32
    %71 = vector.broadcast %cst_37 : f32 to vector<1x256xf32>
    %72 = arith.cmpf ole, %44, %71 : vector<1x256xf32>
    %73 = arith.andi %21, %72 : vector<1x256xi1>
    %74 = arith.extui %73 : vector<1x256xi1> to vector<1x256xi32>
    %75 = arith.sitofp %74 : vector<1x256xi32> to vector<1x256xf32>
    %76 = arith.addf %70, %75 : vector<1x256xf32>
    %c0_38 = arith.constant 0 : index
    %c0_39 = arith.constant 0 : index
    %c0_40 = arith.constant 0 : index
    %77 = vector.load %arg8[%c0_38, %c0_39, %c0_40] : memref<1x1x256xf32, #tpu.memory_space<vmem>>, vector<1x1x256xf32>
    %78 = vector.shape_cast %77 : vector<1x1x256xf32> to vector<1x256xf32>
    %79 = vector.shape_cast %76 : vector<1x256xf32> to vector<1x1x256xf32>
    tpu.vector_store %arg8[%c0_38, %c0_39, %c0_40], %79 {strides = array<i32>} : memref<1x1x256xf32, #tpu.memory_space<vmem>>, vector<1x1x256xf32>,
    return
  }
  func.func @transform_0(%arg0: i32, %arg1: i32) -> (i32, i32, i32) {
    %c0_i32 = arith.constant 0 : i32
    %c0_i32_0 = arith.constant 0 : i32
    return %arg0, %c0_i32, %arg1 : i32, i32, i32
  }
  func.func @transform_1(%arg0: i32, %arg1: i32) -> (i32, i32, i32) {
    %c0_i32 = arith.constant 0 : i32
    %c0_i32_0 = arith.constant 0 : i32
    return %arg0, %c0_i32, %arg1 : i32, i32, i32
  }
  func.func @transform_2(%arg0: i32, %arg1: i32) -> (i32, i32, i32) {
    %c0_i32 = arith.constant 0 : i32
    %c0_i32_0 = arith.constant 0 : i32
    return %arg0, %c0_i32, %arg1 : i32, i32, i32
  }
  func.func @transform_3(%arg0: i32, %arg1: i32) -> (i32, i32, i32) {
    %c0_i32 = arith.constant 0 : i32
    %c0_i32_0 = arith.constant 0 : i32
    return %arg0, %c0_i32, %arg1 : i32, i32, i32
  }
  func.func @transform_4(%arg0: i32, %arg1: i32) -> (i32, i32, i32) {
    %c0_i32 = arith.constant 0 : i32
    %c0_i32_0 = arith.constant 0 : i32
    %c0_i32_1 = arith.constant 0 : i32
    return %arg0, %c0_i32, %c0_i32_0 : i32, i32, i32
  }
  func.func @transform_5(%arg0: i32, %arg1: i32) -> (i32, i32, i32) {
    %c0_i32 = arith.constant 0 : i32
    %c0_i32_0 = arith.constant 0 : i32
    %c0_i32_1 = arith.constant 0 : i32
    return %arg0, %c0_i32, %c0_i32_0 : i32, i32, i32
  }
  func.func @transform_6(%arg0: i32, %arg1: i32) -> (i32, i32, i32) {
    %c0_i32 = arith.constant 0 : i32
    %c0_i32_0 = arith.constant 0 : i32
    %c0_i32_1 = arith.constant 0 : i32
    return %arg0, %c0_i32, %c0_i32_0 : i32, i32, i32
  }
}

module attributes {stable_mosaic.version = 11 : i64} {
  func.func @_ohem_reduce_kernel(%arg0: i32, %arg1: memref<1xf32, #tpu.memory_space<smem>>, %arg2: memref<1x256xf32, #tpu.memory_space<vmem>>, %arg3: memref<1x256xf32, #tpu.memory_space<vmem>>, %arg4: memref<1x128xf32, #tpu.memory_space<vmem>>, %arg5: memref<1x128xf32, #tpu.memory_space<vmem>>) attributes {dimension_semantics = [#tpu.dimension_semantics<parallel>], iteration_bounds = array<i64: 2>, scalar_prefetch = 0 : i64, scratch_operands = 0 : i64, tpu.core_type = #tpu.core_type<tc>, window_params = [{transform_indices = @transform_0, window_bounds = array<i64: 1>}, {transform_indices = @transform_1, window_bounds = array<i64: 1, 256>}, {transform_indices = @transform_2, window_bounds = array<i64: 1, 256>}, {transform_indices = @transform_3, window_bounds = array<i64: 1, 128>}, {transform_indices = @transform_4, window_bounds = array<i64: 1, 128>}]} {
    %c0 = arith.constant 0 : index
    %0 = memref.load %arg1[%c0] : memref<1xf32, #tpu.memory_space<smem>>
    %c0_0 = arith.constant 0 : index
    %c0_1 = arith.constant 0 : index
    %1 = vector.load %arg3[%c0_0, %c0_1] : memref<1x256xf32, #tpu.memory_space<vmem>>, vector<1x256xf32>
    %2 = vector.broadcast %0 : f32 to vector<1x256xf32>
    %3 = arith.cmpf olt, %1, %2 : vector<1x256xf32>
    %4 = arith.extui %3 : vector<1x256xi1> to vector<1x256xi32>
    %5 = arith.sitofp %4 : vector<1x256xi32> to vector<1x256xf32>
    %c0_2 = arith.constant 0 : index
    %c0_3 = arith.constant 0 : index
    %6 = vector.load %arg2[%c0_2, %c0_3] : memref<1x256xf32, #tpu.memory_space<vmem>>, vector<1x256xf32>
    %7 = arith.mulf %6, %5 : vector<1x256xf32>
    %8 = vector.extract_strided_slice %7 {offsets = [0, 0], sizes = [1, 128], strides = [1, 1]} : vector<1x256xf32> to vector<1x128xf32>
    %9 = vector.extract_strided_slice %7 {offsets = [0, 128], sizes = [1, 128], strides = [1, 1]} : vector<1x256xf32> to vector<1x128xf32>
    %10 = arith.addf %8, %9 : vector<1x128xf32>
    %c0_4 = arith.constant 0 : index
    %c0_5 = arith.constant 0 : index
    %11 = vector.load %arg4[%c0_4, %c0_5] : memref<1x128xf32, #tpu.memory_space<vmem>>, vector<1x128xf32>
    tpu.vector_store %arg4[%c0_4, %c0_5], %10 {strides = array<i32>} : memref<1x128xf32, #tpu.memory_space<vmem>>, vector<1x128xf32>,
    %12 = vector.extract_strided_slice %5 {offsets = [0, 0], sizes = [1, 128], strides = [1, 1]} : vector<1x256xf32> to vector<1x128xf32>
    %13 = vector.extract_strided_slice %5 {offsets = [0, 128], sizes = [1, 128], strides = [1, 1]} : vector<1x256xf32> to vector<1x128xf32>
    %14 = arith.addf %12, %13 : vector<1x128xf32>
    %c0_6 = arith.constant 0 : index
    %c0_7 = arith.constant 0 : index
    %15 = vector.load %arg5[%c0_6, %c0_7] : memref<1x128xf32, #tpu.memory_space<vmem>>, vector<1x128xf32>
    tpu.vector_store %arg5[%c0_6, %c0_7], %14 {strides = array<i32>} : memref<1x128xf32, #tpu.memory_space<vmem>>, vector<1x128xf32>,
    return
  }
  func.func @transform_0(%arg0: i32) -> i32 {
    %c0_i32 = arith.constant 0 : i32
    %c0_i32_0 = arith.constant 0 : i32
    return %c0_i32 : i32
  }
  func.func @transform_1(%arg0: i32) -> (i32, i32) {
    %c0_i32 = arith.constant 0 : i32
    %c0_i32_0 = arith.constant 0 : i32
    return %c0_i32, %arg0 : i32, i32
  }
  func.func @transform_2(%arg0: i32) -> (i32, i32) {
    %c0_i32 = arith.constant 0 : i32
    %c0_i32_0 = arith.constant 0 : i32
    return %c0_i32, %arg0 : i32, i32
  }
  func.func @transform_3(%arg0: i32) -> (i32, i32) {
    %c0_i32 = arith.constant 0 : i32
    %c0_i32_0 = arith.constant 0 : i32
    return %c0_i32, %arg0 : i32, i32
  }
  func.func @transform_4(%arg0: i32) -> (i32, i32) {
    %c0_i32 = arith.constant 0 : i32
    %c0_i32_0 = arith.constant 0 : i32
    return %c0_i32, %arg0 : i32, i32
  }
}

</mosaic_0001>

<bundles_post_ra>
// kernel: ohem_cross_entropy.3
= control target key start
LH: loop header
LB: loop body
LE: loop exit
PB: predicated region body
PF: predicated region fallthrough
CT: control target
= control target key end

     0   :  { %s374_s17 = smov 0   ;;  %s397_s0 = inlined_call_operand.<no memory space> [shape: f32[1], index: 0, kind: input, shape index: {}]   ;;  %s398_s1 = inlined_call_operand.vmem [shape: f32[1,512], index: 1, kind: input, shape index: {}]   ;;  %s399_s2 = inlined_call_operand.vmem [shape: f32[1,512], index: 2, kind: input, shape index: {}]   ;;  %s400_s3 = inlined_call_operand.vmem [shape: f32[1,256], index: 3, kind: output, shape index: {0}]   ;;  %s401_s4 = inlined_call_operand.vmem [shape: f32[1,256], index: 4, kind: output, shape index: {1}]  }
   0x1   :  { %10 = sst [smem:[#allocation2]] %s397_s0 }
   0x2 LB: > { %s318_s18 = sadd.s32 4294967295, %s343_s17   ;;  %p322_p0 = scmp.ge.s32.totalorder %s343_s17, 1  ;;  %s343_s17 = sphi %s374_s17, %s16_s17  }
   0x3   : > { %p176_p1 = scmp.lt.s32.totalorder %s343_s17, 3 }
   0x5   : > { %p177_p2 = pnand %p322_p0, %p176_p1 }
   0x6   : > { %s323_s19 = sshll.u32 (!%p177_p2), %s318_s18, 1  ;;  %s222_s20 = sld [smem:[#allocation2]] (!%p177_p2) }
   0x7   : > { %180 = sbr.rel (%p177_p2) target bundleno = 24 (0x18), region = 32  ;;  %p207_p3 = scmp.lt.s32.totalorder (!%p177_p2), %s323_s19, 3 }
   0x8   : > { %p216_p4 = scmp.lt.s32.totalorder (!%p177_p2), %s318_s18, 1 }
   0xc   : > { %s403_s19 = smov (!%p207_p3, %s323_s19), 3  ;;  %s405_s18 = smov (!%p216_p4, %s318_s18), 1  ;;  %v224_v1 = vstv %s222_s20  ;;  %v345_v3 = vmov 0.0  }
   0xd   : > { %s209_s22 = scalar_lea.vmem %s398_s1, %s403_s19  ;;  %s214_s25 = scalar_lea.vmem %s399_s2, %s403_s19 }
   0xe   : > { %v223_v0 = vld [vmem:[%s214_s25] sm:$0x3]  ;;  %s221_s28 = scalar_lea.vmem %s401_s4, %s405_s18  ;;  %s218_s5 = scalar_lea.vmem %s400_s3, %s405_s18 }
   0xf   : > { %v228_v2 = vld [vmem:[%s209_s22] sm:$0x3]  ;;  %vm225_vm0 = vcmp.lt.f32.partialorder %v223_v0, %v224_v1 }
  0x10   : > { %v325_v4 = vsel %vm225_vm0, 1.0, %v345_v3 }
  0x11   : > { %v229_v5 = vmul.f32 %v325_v4, %v228_v2  ;;  %v236_v6 = vrot.slane %v325_v4, 1 }
  0x13   : > { %v231_v7 = vrot.slane %v229_v5, 1  ;;  %v238_v8 = vadd.f32 %v325_v4, %v236_v6 }
  0x15   : > { %v233_v9 = vadd.f32 %v231_v7, %v229_v5  ;;  %239 = vst [vmem:[%s221_s28] sm:$0x1] %v238_v8 }
  0x17   : > { %234 = vst [vmem:[%s218_s5] sm:$0x1] %v233_v9 }
  0x18 PF: > { %s16_s17 = sadd.s32 1, %s343_s17  }
  0x19   : > { %p13_p5 = scmp.ge.s32.totalorder %s16_s17, 4  }
  0x1b   :  { %15 = sbr.rel (!%p13_p5) target bundleno = 2 (0x2), region = 77 }

// kernel: ohem_cross_entropy.2
= control target key start
LH: loop header
LB: loop body
LE: loop exit
PB: predicated region body
PF: predicated region fallthrough
CT: control target
= control target key end

     0   :  { %s974_s21 = smov 0   ;;  %s976_s22 = smov 0   ;;  %s1117_s0 = inlined_call_operand.vmem [shape: f32[2,4,256], index: 0, kind: input, shape index: {}]   ;;  %s1118_s1 = inlined_call_operand.vmem [shape: s32[2,1,256], index: 1, kind: input, shape index: {}]   ;;  %s1119_s2 = inlined_call_operand.vmem [shape: f32[2,1,256], index: 2, kind: output, shape index: {0}]   ;;  %s1120_s3 = inlined_call_operand.vmem [shape: f32[2,1,256], index: 3, kind: output, shape index: {1}]   ;;  %s1121_s4 = inlined_call_operand.vmem [shape: f32[2,1,256], index: 4, kind: output, shape index: {2}]   ;;  %s1122_s5 = inlined_call_operand.vmem [shape: f32[2,1,256], index: 5, kind: output, shape index: {3}]   ;;  %s1123_s6 = inlined_call_operand.vmem [shape: f32[2,1,256], index: 6, kind: output, shape index: {4}]  }
   0x1   :  { %s978_s23 = smov 0  }
   0x2 LB: > { %s29_s24 = sadd.s32 1, %s931_s22  ;;  %p858_p0 = scmp.ge.s32.totalorder %s935_s23, 1  ;;  %s935_s23 = sphi %s978_s23, %s17_s23   ;;  %s931_s22 = sphi %s976_s22, %s1127_s22   ;;  %s927_s21 = sphi %s974_s21, %s1126_s21  }
   0x3   : > { %p31_p1 = scmp.ge.s32.totalorder %s29_s24, 2  ;;  %p260_p2 = scmp.lt.s32.totalorder %s935_s23, 3 }
   0x5   : > { %s1129_s24 = smov (%p31_p1, %s29_s24), 0  ;;  %p261_p3 = pnand %p858_p0, %p260_p2 }
   0x6   : > { %p326_p4 = scmp.lt.s32.totalorder (!%p261_p3), %s927_s21, 1 }
   0x7   : > { %264 = sbr.rel (%p261_p3) target bundleno = 110 (0x6e), region = 28 }
   0xc   : > { %v378_v0 = vlaneseq  ;;  %s1131_s21 = smov (!%p326_p4, %s927_s21), 1  ;;  %v937_v2 = vmov 1966171168   ;;  %vm423_vm1 = vcmask 1043456   ;;  %v938_v9 = vmov 0.0  }
   0xd   : > { %v504_v3 = vunpack.c.l.s4 %v937_v2  ;;  %s873_s25 = sshll.u32 %s1131_s21, 3  ;;  %s994_s26 = sshll.u32 %s1131_s21, 1 }
   0xe   : > { %v992_v1 = vshrl.u32 %v378_v0, 7  ;;  %vm996_vm0 = vcmp.lt.s32.totalorder %v378_v0, 256  ;;  %s333_s29 = scalar_lea.vmem %s1117_s0, %s873_s25  ;;  %s342_s8 = scalar_lea.vmem %s1118_s1, %s994_s26 }
   0xf   : > { %s1013_s11 = scalar_lea.vmem %s1121_s4, %s994_s26  ;;  %v385_v7 = vld [vmem:[%s333_s29] sm:$0xff]  ;;  %s1019_s14 = scalar_lea.vmem %s1122_s5, %s994_s26  ;;  %v505_v13 = vunpack.c.0.s8 %v504_v3 }
  0x10   : > { %v407_v5 = vsub.s32 0, %v992_v1  ;;  %v411_v6 = vsub.s32 1, %v992_v1  ;;  %v386_v8 = vld [vmem:[%s342_s8] sm:$0x3]  ;;  %382 = vst.msk [vmem:[%s1013_s11] sm:$0x3] %vm996_vm0, %v938_v9  ;;  %v401_v10 = vcombine.high %v385_v7, %v385_v7  ;;  %s1036_s17 = scalar_lea.vmem %s1123_s6, %s994_s26  ;;  %s351_s20 = scalar_lea.vmem %s1119_s2, %s994_s26 }
  0x11   : > { %v424_v12 = vsel %vm423_vm1, %v385_v7, -inf  ;;  %383 = vst.msk [vmem:[%s1019_s14] sm:$0x3] %vm996_vm0, %v938_v9  ;;  %384 = vst.msk [vmem:[%s1036_s17] sm:$0x3] %vm996_vm0, %v938_v9  ;;  %v1047_v19 = vsub.s32 %v505_v13, %v992_v1  ;;  %s360_s27 = scalar_lea.vmem %s1120_s3, %s994_s26 }
  0x12   : > { %v1025_v11 = vrot.slane %v386_v8, %v407_v5  ;;  %v425_v14 = vrot.slane %v424_v12, 4  ;;  %v1042_v15 = vrot.slane %v386_v8, %v411_v6  ;;  %v431_v16 = vsel %vm423_vm1, %v401_v10, -inf }
  0x13   : > { %v432_v18 = vrot.slane %v431_v16, 4 }
  0x14   : > { %vm415_vm2 = vcmp.ne.s32.totalorder %v1025_v11, 255  ;;  %v426_v17 = vmax.f32 %v424_v12, %v425_v14  ;;  %vm416_vm3 = vcmp.ne.s32.totalorder %v1042_v15, 255  ;;  %vm419_vm4 = vcmp.eq.s32.totalorder %v1025_v11, 255 }
  0x15   : > { %v867_v20 = vsel %vm415_vm2, 1.0, %v938_v9  ;;  %v433_v22 = vmax.f32 %v431_v16, %v432_v18  ;;  %v868_v23 = vsel %vm416_vm3, 1.0, %v938_v9  ;;  %vm420_vm5 = vcmp.eq.s32.totalorder %v1042_v15, 255 }
  0x16   : > { %v427_v21 = vrot.slane %v426_v17, 2  ;;  %v574_v24 = vcombine.low %v867_v20, %v868_v23  ;;  %v421_v40 = vsel %vm419_vm4, 0, %v1025_v11  ;;  %v422_v41 = vsel %vm420_vm5, 0, %v1042_v15 }
  0x17   : > { %v434_v26 = vrot.slane %v433_v22, 2  ;;  %v469_v42 = vrot.slane %v421_v40, %v407_v5  ;;  %v473_v43 = vrot.slane %v422_v41, %v407_v5 }
  0x18   : > { %v428_v25 = vmax.f32 %v426_v17, %v427_v21  ;;  %v581_v27 = vrot.slane %v574_v24, %v1047_v19  ;;  %v567_v30 = vld [vmem:[%s1019_s14] sm:$0x3] }
  0x19   : > { %v435_v29 = vmax.f32 %v433_v22, %v434_v26  ;;  %vm474_vm6 = vcmp.eq.s32.totalorder %v992_v1, %v469_v42  ;;  %vm475_vm7 = vcmp.eq.s32.totalorder %v992_v1, %v473_v43 }
  0x1a   : > { %v429_v28 = vrot.slane %v428_v25, 1  ;;  %v588_v31 = vrot.slane %v581_v27, %v1047_v19  ;;  %v476_v48 = vsel %vm474_vm6, %v385_v7, 0.0  ;;  %v477_v52 = vsel %vm475_vm7, %v401_v10, 0.0 }
  0x1b   : > { %v436_v33 = vrot.slane %v435_v29, 1  ;;  %v478_v53 = vsel %vm423_vm1, %v476_v48, 0.0  ;;  %v485_v56 = vsel %vm423_vm1, %v477_v52, 0.0 }
  0x1c   : > { %v430_v32 = vmax.f32 %v428_v25, %v429_v28  ;;  %v590_v34 = vadd.f32 %v588_v31, %v567_v30  ;;  %v479_v58 = vrot.slane %v478_v53, 4  ;;  %v486_v60 = vrot.slane %v485_v56, 4  ;;  %v544_v31 = vld [vmem:[%s1013_s11] sm:$0x3] }
  0x1d   : > { %v437_v35 = vmax.f32 %v435_v29, %v436_v33 }
  0x1e   : > { %v438_v36 = vsub.f32 %v385_v7, %v430_v32  ;;  %591 = vst.msk [vmem:[%s1019_s14] sm:$0x3] %vm996_vm0, %v590_v34  ;;  %v480_v63 = vadd.f32 %v479_v58, %v478_v53  ;;  %v487_v2 = vadd.f32 %v486_v60, %v485_v56 }
  0x1f   : > { %v439_v37 = vsub.f32 %v401_v10, %v437_v35 }
  0x20   : > { %v440_v38 = vmul.f32 1.442695, %v438_v36  ;;  %v481_v5 = vrot.slane %v480_v63, 2  ;;  %v488_v6 = vrot.slane %v487_v2, 2 }
  0x21   : > { %v442_v39 = vmul.f32 1.442695, %v439_v37 }
  0x22   : > { %901 = vpow2.f32 %v440_v38  ;;  %v482_v7 = vadd.f32 %v481_v5, %v480_v63  ;;  %v489_v8 = vadd.f32 %v488_v6, %v487_v2 }
  0x23   : > { %903 = vpow2.f32 %v442_v39 }
  0x24   : > { %v483_v10 = vrot.slane %v482_v7, 1  ;;  %v490_v12 = vrot.slane %v489_v8, 1 }
  0x26   : > { %v484_v16 = vadd.f32 %v483_v10, %v482_v7  ;;  %v491_v21 = vadd.f32 %v490_v12, %v489_v8 }
  0x2f   : > { %v902_v44 = vpop.eup %901 }
  0x30   : > { %v444_v45 = vsel %vm423_vm1, %v902_v44, 0.0  ;;  %v904_v46 = vpop.eup %903  ;;  %v592_v44 = vld [vmem:[%s1036_s17] sm:$0x3] }
  0x31   : > { %v445_v47 = vrot.slane %v444_v45, 4  ;;  %v451_v49 = vsel %vm423_vm1, %v904_v46, 0.0 }
  0x32   : > { %v452_v51 = vrot.slane %v451_v49, 4 }
  0x33   : > { %v446_v50 = vadd.f32 %v445_v47, %v444_v45 }
  0x34   : > { %v453_v55 = vadd.f32 %v452_v51, %v451_v49 }
  0x35   : > { %v447_v54 = vrot.slane %v446_v50, 2 }
  0x36   : > { %v454_v59 = vrot.slane %v453_v55, 2 }
  0x37   : > { %v448_v57 = vadd.f32 %v447_v54, %v446_v50 }
  0x38   : > { %v455_v62 = vadd.f32 %v454_v59, %v453_v55 }
  0x39   : > { %v449_v61 = vrot.slane %v448_v57, 1 }
  0x3a   : > { %v456_v1 = vrot.slane %v455_v62, 1 }
  0x3b   : > { %v450_v0 = vadd.f32 %v449_v61, %v448_v57 }
  0x3c   : > { %v457_v3 = vadd.f32 %v456_v1, %v455_v62 }
  0x3d   : > { %905 = vlog2.f32 %v450_v0 }
  0x3e   : > { %907 = vlog2.f32 %v457_v3 }
  0x4a   : > { %v906_v13 = vpop.eup %905 }
  0x4b   : > { %v459_v14 = vmul.f32 0.6931472, %v906_v13  ;;  %v908_v17 = vpop.eup %907 }
  0x4c   : > { %v461_v18 = vmul.f32 0.6931472, %v908_v17 }
  0x4d   : > { %v462_v20 = vadd.f32 %v459_v14, %v430_v32 }
  0x4e   : > { %v463_v22 = vadd.f32 %v461_v18, %v437_v35 }
  0x4f   : > { %v494_v23 = vsub.f32 %v484_v16, %v462_v20  ;;  %v492_v24 = vsub.f32 %v462_v20, %v484_v16 }
  0x50   : > { %v495_v25 = vsub.f32 %v491_v21, %v463_v22  ;;  %v493_v27 = vsub.f32 %v463_v22, %v491_v21 }
  0x51   : > { %v496_v26 = vmul.f32 1.442695, %v494_v23 }
  0x52   : > { %v498_v28 = vmul.f32 1.442695, %v495_v25  ;;  %v502_v29 = vcombine.low %v492_v24, %v493_v27 }
  0x53   : > { %909 = vpow2.f32 %v496_v26 }
  0x54   : > { %911 = vpow2.f32 %v498_v28  ;;  %v509_v30 = vrot.slane %v502_v29, %v1047_v19 }
  0x56   : > { %v516_v32 = vrot.slane %v509_v30, %v1047_v19 }
  0x58   : > { %522 = vst.msk [vmem:[%s351_s20] sm:$0x3] %vm996_vm0, %v516_v32  ;;  %v565_v33 = vadd.f32 %v544_v31, %v516_v32 }
  0x5a   : > { %566 = vst.msk [vmem:[%s1013_s11] sm:$0x3] %vm996_vm0, %v565_v33 }
  0x60   : > { %v910_v34 = vpop.eup %909 }
  0x61   : > { %vm593_vm8 = vcmp.le.f32.partialorder %v910_v34, 0.7  ;;  %v523_v35 = vsel %vm415_vm2, %v910_v34, 2.0  ;;  %v912_v36 = vpop.eup %911 }
  0x62   : > { %vm595_vm9 = vmand %vm415_vm2, %vm593_vm8  ;;  %vm594_vm10 = vcmp.le.f32.partialorder %v912_v36, 0.7  ;;  %v524_v38 = vsel %vm416_vm3, %v912_v36, 2.0 }
  0x63   : > { %v869_v37 = vsel %vm595_vm9, 1.0, %v938_v9  ;;  %vm596_vm11 = vmand %vm416_vm3, %vm594_vm10  ;;  %v527_v39 = vcombine.low %v523_v35, %v524_v38 }
  0x64   : > { %v870_v40 = vsel %vm596_vm11, 1.0, %v938_v9 }
  0x65   : > { %v603_v41 = vcombine.low %v869_v37, %v870_v40  ;;  %v534_v42 = vrot.slane %v527_v39, %v1047_v19 }
  0x67   : > { %v610_v11 = vrot.slane %v603_v41, %v1047_v19  ;;  %v541_v43 = vrot.slane %v534_v42, %v1047_v19 }
  0x69   : > { %v617_v45 = vrot.slane %v610_v11, %v1047_v19  ;;  %543 = vst.msk [vmem:[%s360_s27] sm:$0x3] %vm996_vm0, %v541_v43 }
  0x6b   : > { %v619_v15 = vadd.f32 %v617_v45, %v592_v44 }
  0x6d   : > { %620 = vst.msk [vmem:[%s1036_s17] sm:$0x3] %vm996_vm0, %v619_v15 }
  0x6e PF: > { %s17_s23 = sadd.s32 1, %s935_s23   ;;  %s1126_s21 = smov %s931_s22 }
  0x6f   : > { %p14_p5 = scmp.ge.s32.totalorder %s17_s23, 4   ;;  %s1127_s22 = smov %s1129_s24 }
  0x71   :  { %16 = sbr.rel (!%p14_p5) target bundleno = 2 (0x2), region = 113 }

</bundles_post_ra>
